<compile_context>
chip_gen: v5e
topology: v5e:2x2
jax: 0.10.0
libtpu: 0.0.40
codegen_flags: <defaults>
</compile_context>

<pallas_src>
import functools

import jax
import jax.numpy as jnp
from jax import lax
from jax.experimental import pallas as pl
from jax.experimental.pallas import tpu as pltpu


def _round_up(x, m):
    return (x + m - 1) // m * m


def _choose_batch_tile(batch, block_b=128):
    """Sublane-aligned batch tile that minimizes padding waste.

    For moderate batches (>=16) prefer >=2 grid steps so v7x's two
    TensorCores both get work under dimension_semantics=("parallel",).
    """
    b_padded = _round_up(batch, 8)  # minimal sublane-aligned padding
    tb = next(c for c in (128, 64, 32, 16, 8) if c <= block_b and b_padded % c == 0)
    if batch >= 16 and b_padded // tb < 2 and tb > 8:
        tb //= 2  # still divides b_padded
    return tb, b_padded


def _mlp_kernel(n_layers, x_ref, *refs):
    """refs = (w0, b0, w1, b1, ..., w_{L-1}, b_{L-1}, out_ref).

    Weights are pre-transposed to (in_features, out_features): natural
    (M,K)x(K,N) MXU orientation, no in-kernel transpose.  Activations stay
    f32 between layers; with bf16 weights the LHS is cast only at the MXU
    input and accumulation is f32 (preferred_element_type).
    """
    out_ref = refs[-1]
    h = x_ref[...]  # f32 from the wrapper
    for i in range(n_layers):
        w = refs[2 * i][...]
        b = refs[2 * i + 1][...]
        lhs = h if h.dtype == w.dtype else h.astype(w.dtype)
        h = jnp.dot(lhs, w, preferred_element_type=jnp.float32) + b
        if i != n_layers - 1:  # ReLU on all but the last layer
            h = jnp.maximum(h, 0.0)
    out_ref[...] = h  # single lane-dense, unmasked store


def init_params(key, input_dimension, hidden_dims, output_dimension):
    """PyTorch nn.Linear-style init: U(-1/sqrt(fan_in), +1/sqrt(fan_in)).

    Returns a list of (W, b) with W in PyTorch layout (out_features, in_features).
    """
    dims = [input_dimension] + list(hidden_dims) + [output_dimension]
    params = []
    for i in range(len(dims) - 1):
        fan_in, fan_out = dims[i], dims[i + 1]
        key, kw, kb = jax.random.split(key, 3)
        bound = 1.0 / (fan_in ** 0.5)
        w = jax.random.uniform(kw, (fan_out, fan_in), jnp.float32, -bound, bound)
        b = jax.random.uniform(kb, (fan_out,), jnp.float32, -bound, bound)
        params.append((w, b))
    return params


def linear_net(x, params, *, block_b=128, use_bf16_weights=True):
    """Forward pass equivalent to LinearNet.forward.

    Args:
        x: (B, input_dimension) input.
        params: list of (W, b), W in (out_features, in_features) PyTorch layout.
        block_b: batch-tile upper bound (multiple of 8).
        use_bf16_weights: store weights in bf16 (halves dominant weight DMA);
            biases/activations/accumulation stay f32.
    Returns:
        (B, output_dimension) float32 output.
    """
    B, in_dim = x.shape
    n_layers = len(params)
    out_dim = params[-1][0].shape[0]

    # --- lane-dense padding of every feature dimension to a multiple of 128 ---
    dims = [in_dim] + [w.shape[0] for w, _ in params]
    pdims = [_round_up(d, 128) for d in dims]
    in_pad, out_pad = pdims[0], pdims[-1]

    w_dtype = jnp.bfloat16 if use_bf16_weights else jnp.float32

    flat_params = []
    param_specs = []
    for li, (w, b) in enumerate(params):
        di, do = dims[li], dims[li + 1]
        pi, po = pdims[li], pdims[li + 1]
        # one-time wrapper-side transpose to (in_features, out_features) + zero pad
        wt = jnp.zeros((pi, po), jnp.float32).at[:di, :do].set(w.T.astype(jnp.float32))
        bp = jnp.zeros((1, po), jnp.float32).at[0, :do].set(b.astype(jnp.float32))
        flat_params.append(wt.astype(w_dtype))
        flat_params.append(bp)
        # constant block index -> fetched once, VMEM-resident across all batch tiles
        param_specs.append(pl.BlockSpec((pi, po), lambda i: (0, 0)))
        param_specs.append(pl.BlockSpec((1, po), lambda i: (0, 0)))

    # --- batch tiling ---
    tb, b_padded = _choose_batch_tile(B, block_b)
    x_p = x.astype(jnp.float32)
    if (b_padded, in_pad) != (B, in_dim):
        x_p = jnp.pad(x_p, ((0, b_padded - B), (0, in_pad - in_dim)))

    in_specs = [pl.BlockSpec((tb, in_pad), lambda i: (i, 0))] + param_specs

    # --- VMEM budget guard (v7x: 64 MiB physical, 32 MiB scoped default) ---
    vmem_bytes = (2 * (tb * in_pad + tb * out_pad) * 4          # x/out double-buffered
                  + 2 * sum(a.size * a.dtype.itemsize for a in flat_params))
    if vmem_bytes > 32 * 1024 * 1024:
        # TODO(synk): add a K-tiled path (reduction grid axis + f32 VMEM
        # accumulator) for very large in_dim instead of failing.
        raise ValueError(
            f"estimated working set {vmem_bytes} B exceeds 32 MiB VMEM budget; "
            "reduce block_b or tile the feature dimension")

    flops = 2 * b_padded * sum(pdims[i] * pdims[i + 1] for i in range(n_layers))
    bytes_accessed = (x_p.size * 4 + b_padded * out_pad * 4
                      + sum(a.size * a.dtype.itemsize for a in flat_params))
    cost = pl.CostEstimate(flops=flops, transcendentals=0,
                           bytes_accessed=bytes_accessed)

    kernel = functools.partial(_mlp_kernel, n_layers)

    out_padded = pl.pallas_call(
        kernel,
        out_shape=jax.ShapeDtypeStruct((b_padded, out_pad), jnp.float32),
        grid_spec=pltpu.PrefetchScalarGridSpec(
            num_scalar_prefetch=0,
            grid=(b_padded // tb,),
            in_specs=in_specs,
            out_specs=pl.BlockSpec((tb, out_pad), lambda i: (i, 0)),
        ),
        compiler_params=pltpu.CompilerParams(
            dimension_semantics=("parallel",),  # v7x: split batch tiles across both TCs
        ),
        cost_estimate=cost,
    )(x_p, *flat_params)

    return out_padded[:B, :out_dim]


def _reference(x, params):
    """Pure-JAX f32 reference (highest precision) matching LinearNet.forward."""
    h = x.astype(jnp.float32)
    n = len(params)
    for i, (w, b) in enumerate(params):
        h = lax.dot_general(h, w, (((1,), (1,)), ((), ())),
                            precision=lax.Precision.HIGHEST,
                            preferred_element_type=jnp.float32) + b.reshape(1, -1)
        if i != n - 1:
            h = jnp.maximum(h, 0.0)
    return h


if __name__ == "__main__":
    # Small config consistent with LinearNet:
    #   input_dimension=1024 (flattened observation), hidden_dims=[64, 32],
    #   output_dimension=8.
    input_dimension = 1024
    hidden_dims = [64, 32]
    output_dimension = 8

    key = jax.random.PRNGKey(0)
    key, kx = jax.random.split(key)
    params = init_params(key, input_dimension, hidden_dims, output_dimension)

    # --- default path: bf16 weights, tiny batch (B=2) ---
    B = 2
    x = jax.random.normal(kx, (B, input_dimension), dtype=jnp.float32)
    out = linear_net(x, params)                      # use_bf16_weights=True (default)
    jax.block_until_ready(out)
    assert out.shape == (B, output_dimension), out.shape
    ref = _reference(x, params)
    # bf16 weight storage (f32 accumulation): not bit-for-bit vs f32 reference.
    assert bool(jnp.all(jnp.abs(out - ref) <= 5e-2 + 5e-2 * jnp.abs(ref))), (
        "bf16-weight kernel output does not match reference")

    # --- f32 path, awkward batch size exercising the tb heuristic (136 pad, not 256) ---
    B2 = 130
    key, kx2 = jax.random.split(key)
    x2 = jax.random.normal(kx2, (B2, input_dimension), dtype=jnp.float32)
    out2 = linear_net(x2, params, use_bf16_weights=False)
    jax.block_until_ready(out2)
    assert out2.shape == (B2, output_dimension), out2.shape
    ref2 = _reference(x2, params)
    # default-precision MXU f32 vs HIGHEST-precision reference: tight but not bitwise.
    assert bool(jnp.all(jnp.abs(out2 - ref2) <= 2e-3 + 2e-3 * jnp.abs(ref2))), (
        "f32 kernel output does not match reference")

    print("KERNEL_OK")
</pallas_src>

<mosaic_0001>
module attributes {stable_mosaic.version = 11 : i64} {
  func.func @_mlp_kernel(%arg0: i32, %arg1: memref<8x1024xf32, #tpu.memory_space<vmem>>, %arg2: memref<1024x128xbf16, #tpu.memory_space<vmem>>, %arg3: memref<1x128xf32, #tpu.memory_space<vmem>>, %arg4: memref<128x128xbf16, #tpu.memory_space<vmem>>, %arg5: memref<1x128xf32, #tpu.memory_space<vmem>>, %arg6: memref<128x128xbf16, #tpu.memory_space<vmem>>, %arg7: memref<1x128xf32, #tpu.memory_space<vmem>>, %arg8: memref<8x128xf32, #tpu.memory_space<vmem>>) attributes {dimension_semantics = [#tpu.dimension_semantics<parallel>], iteration_bounds = array<i64: 1>, scalar_prefetch = 0 : i64, scratch_operands = 0 : i64, tpu.core_type = #tpu.core_type<tc>, window_params = [{transform_indices = @transform_0, window_bounds = array<i64: 8, 1024>}, {pipeline_mode = #tpu.pipeline_mode<synchronous>, transform_indices = @transform_1, window_bounds = array<i64: 1024, 128>}, {pipeline_mode = #tpu.pipeline_mode<synchronous>, transform_indices = @transform_2, window_bounds = array<i64: 1, 128>}, {pipeline_mode = #tpu.pipeline_mode<synchronous>, transform_indices = @transform_3, window_bounds = array<i64: 128, 128>}, {pipeline_mode = #tpu.pipeline_mode<synchronous>, transform_indices = @transform_4, window_bounds = array<i64: 1, 128>}, {pipeline_mode = #tpu.pipeline_mode<synchronous>, transform_indices = @transform_5, window_bounds = array<i64: 128, 128>}, {pipeline_mode = #tpu.pipeline_mode<synchronous>, transform_indices = @transform_6, window_bounds = array<i64: 1, 128>}, {transform_indices = @transform_7, window_bounds = array<i64: 8, 128>}]} {
    %c0 = arith.constant 0 : index
    %c0_0 = arith.constant 0 : index
    %0 = vector.load %arg1[%c0, %c0_0] : memref<8x1024xf32, #tpu.memory_space<vmem>>, vector<8x1024xf32>
    %c0_1 = arith.constant 0 : index
    %c0_2 = arith.constant 0 : index
    %1 = vector.load %arg2[%c0_1, %c0_2] : memref<1024x128xbf16, #tpu.memory_space<vmem>>, vector<1024x128xbf16>
    %c0_3 = arith.constant 0 : index
    %c0_4 = arith.constant 0 : index
    %2 = vector.load %arg3[%c0_3, %c0_4] : memref<1x128xf32, #tpu.memory_space<vmem>>, vector<1x128xf32>
    %3 = arith.truncf %0 : vector<8x1024xf32> to vector<8x1024xbf16>
    %cst = arith.constant dense<0.000000e+00> : vector<8x128xf32>
    %4 = tpu.matmul %3, %1, %cst {dimension_numbers = #tpu.dot_dimension_numbers<[1], [0], [0], [1], [0, 0, 1, 1], [], []>} : vector<8x1024xbf16>, vector<1024x128xbf16>, vector<8x128xf32> -> vector<8x128xf32>
    %5 = vector.broadcast %2 : vector<1x128xf32> to vector<8x128xf32>
    %6 = arith.addf %4, %5 : vector<8x128xf32>
    %cst_5 = arith.constant 0.000000e+00 : f32
    %7 = vector.broadcast %cst_5 : f32 to vector<8x128xf32>
    %8 = arith.maximumf %6, %7 : vector<8x128xf32>
    %c0_6 = arith.constant 0 : index
    %c0_7 = arith.constant 0 : index
    %9 = vector.load %arg4[%c0_6, %c0_7] : memref<128x128xbf16, #tpu.memory_space<vmem>>, vector<128x128xbf16>
    %c0_8 = arith.constant 0 : index
    %c0_9 = arith.constant 0 : index
    %10 = vector.load %arg5[%c0_8, %c0_9] : memref<1x128xf32, #tpu.memory_space<vmem>>, vector<1x128xf32>
    %11 = arith.truncf %8 : vector<8x128xf32> to vector<8x128xbf16>
    %cst_10 = arith.constant dense<0.000000e+00> : vector<8x128xf32>
    %12 = tpu.matmul %11, %9, %cst_10 {dimension_numbers = #tpu.dot_dimension_numbers<[1], [0], [0], [1], [0, 0, 1, 1], [], []>} : vector<8x128xbf16>, vector<128x128xbf16>, vector<8x128xf32> -> vector<8x128xf32>
    %13 = vector.broadcast %10 : vector<1x128xf32> to vector<8x128xf32>
    %14 = arith.addf %12, %13 : vector<8x128xf32>
    %cst_11 = arith.constant 0.000000e+00 : f32
    %15 = vector.broadcast %cst_11 : f32 to vector<8x128xf32>
    %16 = arith.maximumf %14, %15 : vector<8x128xf32>
    %c0_12 = arith.constant 0 : index
    %c0_13 = arith.constant 0 : index
    %17 = vector.load %arg6[%c0_12, %c0_13] : memref<128x128xbf16, #tpu.memory_space<vmem>>, vector<128x128xbf16>
    %c0_14 = arith.constant 0 : index
    %c0_15 = arith.constant 0 : index
    %18 = vector.load %arg7[%c0_14, %c0_15] : memref<1x128xf32, #tpu.memory_space<vmem>>, vector<1x128xf32>
    %19 = arith.truncf %16 : vector<8x128xf32> to vector<8x128xbf16>
    %cst_16 = arith.constant dense<0.000000e+00> : vector<8x128xf32>
    %20 = tpu.matmul %19, %17, %cst_16 {dimension_numbers = #tpu.dot_dimension_numbers<[1], [0], [0], [1], [0, 0, 1, 1], [], []>} : vector<8x128xbf16>, vector<128x128xbf16>, vector<8x128xf32> -> vector<8x128xf32>
    %21 = vector.broadcast %18 : vector<1x128xf32> to vector<8x128xf32>
    %22 = arith.addf %20, %21 : vector<8x128xf32>
    %c0_17 = arith.constant 0 : index
    %c0_18 = arith.constant 0 : index
    %23 = vector.load %arg8[%c0_17, %c0_18] : memref<8x128xf32, #tpu.memory_space<vmem>>, vector<8x128xf32>
    tpu.vector_store %arg8[%c0_17, %c0_18], %22 {strides = array<i32>} : memref<8x128xf32, #tpu.memory_space<vmem>>, vector<8x128xf32>,
    return
  }
  func.func @transform_0(%arg0: i32) -> (i32, i32) {
    %c0_i32 = arith.constant 0 : i32
    %c0_i32_0 = arith.constant 0 : i32
    return %arg0, %c0_i32 : i32, i32
  }
  func.func @transform_1(%arg0: i32) -> (i32, i32) {
    %c0_i32 = arith.constant 0 : i32
    %c0_i32_0 = arith.constant 0 : i32
    %c0_i32_1 = arith.constant 0 : i32
    return %c0_i32, %c0_i32_0 : i32, i32
  }
  func.func @transform_2(%arg0: i32) -> (i32, i32) {
    %c0_i32 = arith.constant 0 : i32
    %c0_i32_0 = arith.constant 0 : i32
    %c0_i32_1 = arith.constant 0 : i32
    return %c0_i32, %c0_i32_0 : i32, i32
  }
  func.func @transform_3(%arg0: i32) -> (i32, i32) {
    %c0_i32 = arith.constant 0 : i32
    %c0_i32_0 = arith.constant 0 : i32
    %c0_i32_1 = arith.constant 0 : i32
    return %c0_i32, %c0_i32_0 : i32, i32
  }
  func.func @transform_4(%arg0: i32) -> (i32, i32) {
    %c0_i32 = arith.constant 0 : i32
    %c0_i32_0 = arith.constant 0 : i32
    %c0_i32_1 = arith.constant 0 : i32
    return %c0_i32, %c0_i32_0 : i32, i32
  }
  func.func @transform_5(%arg0: i32) -> (i32, i32) {
    %c0_i32 = arith.constant 0 : i32
    %c0_i32_0 = arith.constant 0 : i32
    %c0_i32_1 = arith.constant 0 : i32
    return %c0_i32, %c0_i32_0 : i32, i32
  }
  func.func @transform_6(%arg0: i32) -> (i32, i32) {
    %c0_i32 = arith.constant 0 : i32
    %c0_i32_0 = arith.constant 0 : i32
    %c0_i32_1 = arith.constant 0 : i32
    return %c0_i32, %c0_i32_0 : i32, i32
  }
  func.func @transform_7(%arg0: i32) -> (i32, i32) {
    %c0_i32 = arith.constant 0 : i32
    %c0_i32_0 = arith.constant 0 : i32
    return %arg0, %c0_i32 : i32, i32
  }
}

</mosaic_0001>

<bundles_post_ra>
// kernel: tpu_custom_call.1
= control target key start
LH: loop header
LB: loop body
LE: loop exit
PB: predicated region body
PF: predicated region fallthrough
CT: control target
= control target key end

     0   :  { %12 = vsyncpa [#allocation3], 0  ;;  %s1519_s0 = inlined_call_operand.hbm [shape: f32[8,1024], index: 0, kind: input, shape index: {}]   ;;  %s1520_s1 = inlined_call_operand.hbm [shape: bf16[1024,128], index: 1, kind: input, shape index: {}]   ;;  %s1521_s2 = inlined_call_operand.vmem [shape: f32[1,128], index: 2, kind: input, shape index: {}]   ;;  %s1522_s3 = inlined_call_operand.hbm [shape: bf16[128,128], index: 3, kind: input, shape index: {}]   ;;  %s1523_s4 = inlined_call_operand.vmem [shape: f32[1,128], index: 4, kind: input, shape index: {}]   ;;  %s1524_s5 = inlined_call_operand.hbm [shape: bf16[128,128], index: 5, kind: input, shape index: {}]   ;;  %s1525_s6 = inlined_call_operand.vmem [shape: f32[1,128], index: 6, kind: input, shape index: {}]   ;;  %s1526_s7 = inlined_call_operand.hbm [shape: f32[8,128], index: 7, kind: output, shape index: {}]  }
   0x1   :  { %13 = vsyncpa [#allocation6], 0 }
   0x2   :  { %14 = vsyncpa [#allocation9], 0  ;;  %s31_s26 = sshll.u32 %s1520_s1, 4  ;;  %s32_s26 = int_to_ptr.hbm [resolvable:$true] %s31_s26 }
   0x3   :  { %15 = vsyncpa [#allocation4], 0  ;;  %s1448_s27 = smov [#allocation5]   ;;  %s21_s8 = sshll.u32 %s1519_s0, 4  ;;  %s22_s8 = int_to_ptr.hbm [resolvable:$true] %s21_s8 }
   0x4   :  { %s33_s28 = sshll.u32 %s1448_s27, 4  ;;  %s1449_s9 = smov 64   ;;  %s34_s28 = int_to_ptr.vmem [resolvable:$true] %s33_s28 }
   0x5   :  { %s1450_s10 = smov 4   ;;  %s1451_s11 = smov [#allocation2]  }
   0x6   :  { %39 = dma.hbm_to_vmem [thread:$0]  %s32_s26, 8192, %s34_s28, [#allocation6], %s1449_s9, %s1449_s9, %s1450_s10  }
   0x7   :  { %s23_s12 = sshll.u32 %s1451_s11, 4  ;;  %s46_s15 = sshll.u32 %s1522_s3, 4  ;;  %s24_s12 = int_to_ptr.vmem [resolvable:$true] %s23_s12  ;;  %s47_s15 = int_to_ptr.hbm [resolvable:$true] %s46_s15 }
   0x8   :  { %26 = dma.hbm_to_vmem [thread:$0]  %s22_s8, 1024, %s24_s12, [#allocation3]  }
   0x9   :  { %s61_s17 = sshll.u32 %s1524_s5, 4  ;;  %s1452_s18 = smov [#allocation7]   ;;  %s62_s17 = int_to_ptr.hbm [resolvable:$true] %s61_s17 }
   0xa   :  { %s48_s19 = sshll.u32 %s1452_s18, 4  ;;  %s1453_s0 = smov [#allocation8]   ;;  %s49_s19 = int_to_ptr.vmem [resolvable:$true] %s48_s19 }
   0xb   :  { %54 = dma.hbm_to_vmem [thread:$0]  %s47_s15, 1024, %s49_s19, [#allocation6], %s1449_s9, %s1449_s9, %s1450_s10  }
   0xc   :  { %s63_s20 = sshll.u32 %s1453_s0, 4  ;;  %s64_s20 = int_to_ptr.vmem [resolvable:$true] %s63_s20 }
   0xd   :  { %69 = dma.hbm_to_vmem [thread:$0]  %s62_s17, 1024, %s64_s20, [#allocation9], %s1449_s9, %s1449_s9, %s1450_s10  }
   0xe   :  { %1440 = dma.done.wait [#allocation3], 1024  }
   0xf   :  { %1441 = vsyncadd [#allocation3], 4294966272 }
  0x10   :  { %1442 = dma.done.wait [#allocation6], 9216  }
  0x11   :  { %1443 = vsyncadd [#allocation6], 4294958080 }
  0x12   :  { %1444 = dma.done.wait [#allocation9], 1024  }
  0x13   :  { %1445 = vsyncadd [#allocation9], 4294966272  ;;  %v1237_v0 = vld [vmem:[#allocation5 + $0x38] sm:$0xff]  ;;  %v1236_v4 = vld [vmem:[#allocation5 + $0x30] sm:$0xff]  ;;  %s1454_s24 = smov [#allocation10]   ;;  %s898_s28 = sshll.u32 %s1526_s7, 4  ;;  %s899_s28 = int_to_ptr.hbm [resolvable:$true] %s898_s28 }
  0x14   :  { %v1245_v1 = vld [vmem:[#allocation5 + $0x78] sm:$0xff]  ;;  %620 = vmatpush.bf16.msra.mxu0 %v1237_v0  ;;  %v1244_v5 = vld [vmem:[#allocation5 + $0x70] sm:$0xff]  ;;  %v1235_v8 = vld [vmem:[#allocation5 + $0x28] sm:$0xff]  ;;  %s896_s25 = sshll.u32 %s1454_s24, 4  ;;  %s897_s25 = int_to_ptr.vmem [resolvable:$true] %s896_s25 }
  0x15   :  { %v1253_v2 = vld [vmem:[#allocation5 + $0xb8] sm:$0xff]  ;;  %633 = vmatpush.bf16.msra.mxu1 %v1245_v1  ;;  %v1252_v6 = vld [vmem:[#allocation5 + $0xb0] sm:$0xff]  ;;  %v1243_v9 = vld [vmem:[#allocation5 + $0x68] sm:$0xff] }
  0x16   :  { %v1261_v3 = vld [vmem:[#allocation5 + $0xf8] sm:$0xff]  ;;  %646 = vmatpush.bf16.msra.mxu2 %v1253_v2  ;;  %v1260_v7 = vld [vmem:[#allocation5 + $0xf0] sm:$0xff]  ;;  %v1251_v10 = vld [vmem:[#allocation5 + $0xa8] sm:$0xff] }
  0x17   :  { %659 = vmatpush.bf16.msra.mxu3 %v1261_v3  ;;  %v1259_v11 = vld [vmem:[#allocation5 + $0xe8] sm:$0xff]  ;;  %v1234_v12 = vld [vmem:[#allocation5 + $0x20] sm:$0xff]  ;;  %v1233_v16 = vld [vmem:[#allocation5 + $0x18] sm:$0xff] }
  0x18   :  { %621 = vmatpush.bf16.msra.mxu0 %v1236_v4  ;;  %v1242_v13 = vld [vmem:[#allocation5 + $0x60] sm:$0xff]  ;;  %v1241_v17 = vld [vmem:[#allocation5 + $0x58] sm:$0xff]  ;;  %v1232_v20 = vld [vmem:[#allocation5 + $0x10] sm:$0xff] }
  0x19   :  { %634 = vmatpush.bf16.msra.mxu1 %v1244_v5  ;;  %v1250_v14 = vld [vmem:[#allocation5 + $0xa0] sm:$0xff]  ;;  %v1249_v18 = vld [vmem:[#allocation5 + $0x98] sm:$0xff]  ;;  %v1240_v21 = vld [vmem:[#allocation5 + $0x50] sm:$0xff] }
  0x1a   :  { %647 = vmatpush.bf16.msra.mxu2 %v1252_v6  ;;  %v1258_v15 = vld [vmem:[#allocation5 + $0xe0] sm:$0xff]  ;;  %v1257_v19 = vld [vmem:[#allocation5 + $0xd8] sm:$0xff]  ;;  %v1248_v22 = vld [vmem:[#allocation5 + $0x90] sm:$0xff] }
  0x1b   :  { %660 = vmatpush.bf16.msra.mxu3 %v1260_v7  ;;  %v1256_v23 = vld [vmem:[#allocation5 + $0xd0] sm:$0xff]  ;;  %v1231_v24 = vld [vmem:[#allocation5 + $0x8] sm:$0xff]  ;;  %v1230_v28 = vld [vmem:[#allocation5] sm:$0xff] }
  0x1c   :  { %622 = vmatpush.bf16.msra.mxu0 %v1235_v8  ;;  %v1239_v25 = vld [vmem:[#allocation5 + $0x48] sm:$0xff]  ;;  %v1238_v29 = vld [vmem:[#allocation5 + $0x40] sm:$0xff]  ;;  %v1269_v32 = vld [vmem:[#allocation5 + $0x138] sm:$0xff] }
  0x1d   :  { %635 = vmatpush.bf16.msra.mxu1 %v1243_v9  ;;  %v1247_v26 = vld [vmem:[#allocation5 + $0x88] sm:$0xff]  ;;  %v1246_v30 = vld [vmem:[#allocation5 + $0x80] sm:$0xff]  ;;  %v90_v33 = vld [vmem:[#allocation2 + $0x10] sm:$0xff] }
  0x1e   :  { %648 = vmatpush.bf16.msra.mxu2 %v1251_v10  ;;  %v1255_v27 = vld [vmem:[#allocation5 + $0xc8] sm:$0xff]  ;;  %v1254_v31 = vld [vmem:[#allocation5 + $0xc0] sm:$0xff]  ;;  %v1277_v35 = vld [vmem:[#allocation5 + $0x178] sm:$0xff]  ;;  %v227_v40 = vpack.c.bf16 %v90_v33, %v90_v33 }
  0x1f   :  { %661 = vmatpush.bf16.msra.mxu3 %v1259_v11  ;;  %v88_v34 = vld [vmem:[#allocation2] sm:$0xff]  ;;  %v91_v36 = vld [vmem:[#allocation2 + $0x18] sm:$0xff]  ;;  %v89_v37 = vld [vmem:[#allocation2 + $0x8] sm:$0xff] }
  0x20   :  { %623 = vmatpush.bf16.msra.mxu0 %v1234_v12  ;;  %v1285_v38 = vld [vmem:[#allocation5 + $0x1b8] sm:$0xff]  ;;  %v225_v41 = vpack.c.bf16 %v88_v34, %v88_v34  ;;  %v228_v42 = vpack.c.bf16 %v91_v36, %v91_v36  ;;  %v226_v43 = vpack.c.bf16 %v89_v37, %v89_v37  ;;  %v1268_v44 = vld [vmem:[#allocation5 + $0x130] sm:$0xff]  ;;  %v1267_v48 = vld [vmem:[#allocation5 + $0x128] sm:$0xff] }
  0x21   :  { %636 = vmatpush.bf16.msra.mxu1 %v1242_v13  ;;  %v1293_v39 = vld [vmem:[#allocation5 + $0x1f8] sm:$0xff]  ;;  %v1276_v45 = vld [vmem:[#allocation5 + $0x170] sm:$0xff]  ;;  %v1275_v49 = vld [vmem:[#allocation5 + $0x168] sm:$0xff] }
  0x22   :  { %649 = vmatpush.bf16.msra.mxu2 %v1250_v14  ;;  %v1284_v46 = vld [vmem:[#allocation5 + $0x1b0] sm:$0xff]  ;;  %v1283_v50 = vld [vmem:[#allocation5 + $0x1a8] sm:$0xff]  ;;  %v1266_v52 = vld [vmem:[#allocation5 + $0x120] sm:$0xff] }
  0x23   :  { %662 = vmatpush.bf16.msra.mxu3 %v1258_v15  ;;  %v1292_v47 = vld [vmem:[#allocation5 + $0x1f0] sm:$0xff]  ;;  %v1291_v51 = vld [vmem:[#allocation5 + $0x1e8] sm:$0xff]  ;;  %v1274_v53 = vld [vmem:[#allocation5 + $0x160] sm:$0xff] }
  0x24   :  { %624 = vmatpush.bf16.msra.mxu0 %v1233_v16  ;;  %v1282_v54 = vld [vmem:[#allocation5 + $0x1a0] sm:$0xff]  ;;  %v1265_v56 = vld [vmem:[#allocation5 + $0x118] sm:$0xff]  ;;  %v1264_v60 = vld [vmem:[#allocation5 + $0x110] sm:$0xff] }
  0x25   :  { %637 = vmatpush.bf16.msra.mxu1 %v1241_v17  ;;  %v1290_v55 = vld [vmem:[#allocation5 + $0x1e0] sm:$0xff]  ;;  %v1273_v57 = vld [vmem:[#allocation5 + $0x158] sm:$0xff]  ;;  %v1272_v61 = vld [vmem:[#allocation5 + $0x150] sm:$0xff] }
  0x26   :  { %650 = vmatpush.bf16.msra.mxu2 %v1249_v18  ;;  %v1281_v58 = vld [vmem:[#allocation5 + $0x198] sm:$0xff]  ;;  %v1280_v62 = vld [vmem:[#allocation5 + $0x190] sm:$0xff]  ;;  %v1263_v0 = vld [vmem:[#allocation5 + $0x108] sm:$0xff] }
  0x27   :  { %663 = vmatpush.bf16.msra.mxu3 %v1257_v19  ;;  %v1289_v59 = vld [vmem:[#allocation5 + $0x1d8] sm:$0xff]  ;;  %v1288_v63 = vld [vmem:[#allocation5 + $0x1d0] sm:$0xff]  ;;  %v1271_v1 = vld [vmem:[#allocation5 + $0x148] sm:$0xff] }
  0x28   :  { %625 = vmatpush.bf16.msra.mxu0 %v1232_v20  ;;  %v1279_v2 = vld [vmem:[#allocation5 + $0x188] sm:$0xff]  ;;  %v1262_v4 = vld [vmem:[#allocation5 + $0x100] sm:$0xff]  ;;  %v94_v10 = vld [vmem:[#allocation2 + $0x30] sm:$0xff] }
  0x29   :  { %638 = vmatpush.bf16.msra.mxu1 %v1240_v21  ;;  %v1287_v3 = vld [vmem:[#allocation5 + $0x1c8] sm:$0xff]  ;;  %v1270_v5 = vld [vmem:[#allocation5 + $0x140] sm:$0xff]  ;;  %v95_v11 = vld [vmem:[#allocation2 + $0x38] sm:$0xff]  ;;  %v231_v14 = vpack.c.bf16 %v94_v10, %v94_v10 }
  0x2a   :  { %651 = vmatpush.bf16.msra.mxu2 %v1248_v22  ;;  %v1278_v6 = vld [vmem:[#allocation5 + $0x180] sm:$0xff]  ;;  %v93_v8 = vld [vmem:[#allocation2 + $0x28] sm:$0xff]  ;;  %v232_v15 = vpack.c.bf16 %v95_v11, %v95_v11  ;;  %v1301_v16 = vld [vmem:[#allocation7 + $0x38] sm:$0xff] }
  0x2b   :  { %664 = vmatpush.bf16.msra.mxu3 %v1256_v23  ;;  %v92_v7 = vld [vmem:[#allocation2 + $0x20] sm:$0xff]  ;;  %v230_v13 = vpack.c.bf16 %v93_v8, %v93_v8  ;;  %v1300_v17 = vld [vmem:[#allocation7 + $0x30] sm:$0xff]  ;;  %v1299_v18 = vld [vmem:[#allocation7 + $0x28] sm:$0xff] }
  0x2c   :  { %626 = vmatpush.bf16.msra.mxu0 %v1231_v24  ;;  %v1286_v9 = vld [vmem:[#allocation5 + $0x1c0] sm:$0xff]  ;;  %v229_v12 = vpack.c.bf16 %v92_v7, %v92_v7  ;;  %v1297_v20 = vld [vmem:[#allocation7 + $0x18] sm:$0xff]  ;;  %v1296_v22 = vld [vmem:[#allocation7 + $0x10] sm:$0xff] }
  0x2d   :  { %639 = vmatpush.bf16.msra.mxu1 %v1239_v25  ;;  %v1298_v19 = vld [vmem:[#allocation7 + $0x20] sm:$0xff]  ;;  %v1295_v24 = vld [vmem:[#allocation7 + $0x8] sm:$0xff]  ;;  %v1308_v34 = vld [vmem:[#allocation8 + $0x30] sm:$0xff] }
  0x2e   :  { %652 = vmatpush.bf16.msra.mxu2 %v1247_v26  ;;  %v1307_v36 = vld [vmem:[#allocation8 + $0x28] sm:$0xff] }
  0x2f   :  { %665 = vmatpush.bf16.msra.mxu3 %v1255_v27 }
  0x30   :  { %627 = vmatpush.bf16.msra.mxu0 %v1230_v28  ;;  %v1294_v28 = vld [vmem:[#allocation7] sm:$0xff] }
  0x31   :  { %640 = vmatpush.bf16.msra.mxu1 %v1238_v29 }
  0x32   :  { %653 = vmatpush.bf16.msra.mxu2 %v1246_v30  ;;  %v1317_v30 = vld [vmem:[%s1521_s2] ss:$0 sm:$0xff] }
  0x33   :  { %666 = vmatpush.bf16.msra.mxu3 %v1254_v31  ;;  %628 = vmatmul.bf16.vlgmr.msra.gmra.mxu0 %v225_v41  ;;  %v1309_v31 = vld [vmem:[#allocation8 + $0x38] sm:$0xff] }
  0x34   :  { %672 = vmatpush.bf16.msrb.mxu0 %v1269_v32  ;;  %641 = vmatmul.bf16.vlgmr.msra.gmra.mxu1 %v226_v43 }
  0x35   :  { %685 = vmatpush.bf16.msrb.mxu1 %v1277_v35  ;;  %654 = vmatmul.bf16.vlgmr.msra.gmra.mxu2 %v227_v40  ;;  %v1305_v40 = vld [vmem:[#allocation8 + $0x18] sm:$0xff] }
  0x36   :  { %698 = vmatpush.bf16.msrb.mxu2 %v1285_v38  ;;  %667 = vmatmul.bf16.vlgmr.msra.gmra.mxu3 %v228_v42  ;;  %v1306_v38 = vld [vmem:[#allocation8 + $0x20] sm:$0xff] }
  0x37   :  { %711 = vmatpush.bf16.msrb.mxu3 %v1293_v39 }
  0x38   :  { %673 = vmatpush.bf16.msrb.mxu0 %v1268_v44 }
  0x39   :  { %686 = vmatpush.bf16.msrb.mxu1 %v1276_v45  ;;  %v1304_v45 = vld [vmem:[#allocation8 + $0x10] sm:$0xff] }
  0x3a   :  { %699 = vmatpush.bf16.msrb.mxu2 %v1284_v46 }
  0x3b   :  { %712 = vmatpush.bf16.msrb.mxu3 %v1292_v47 }
  0x3c   :  { %674 = vmatpush.bf16.msrb.mxu0 %v1267_v48 }
  0x3d   :  { %687 = vmatpush.bf16.msrb.mxu1 %v1275_v49 }
  0x3e   :  { %700 = vmatpush.bf16.msrb.mxu2 %v1283_v50 }
  0x3f   :  { %713 = vmatpush.bf16.msrb.mxu3 %v1291_v51 }
  0x40   :  { %675 = vmatpush.bf16.msrb.mxu0 %v1266_v52 }
  0x41   :  { %688 = vmatpush.bf16.msrb.mxu1 %v1274_v53 }
  0x42   :  { %701 = vmatpush.bf16.msrb.mxu2 %v1282_v54 }
  0x43   :  { %714 = vmatpush.bf16.msrb.mxu3 %v1290_v55 }
  0x44   :  { %676 = vmatpush.bf16.msrb.mxu0 %v1265_v56 }
  0x45   :  { %689 = vmatpush.bf16.msrb.mxu1 %v1273_v57  ;;  %v1303_v57 = vld [vmem:[#allocation8 + $0x8] sm:$0xff] }
  0x46   :  { %702 = vmatpush.bf16.msrb.mxu2 %v1281_v58  ;;  %v1302_v58 = vld [vmem:[#allocation8] sm:$0xff] }
  0x47   :  { %715 = vmatpush.bf16.msrb.mxu3 %v1289_v59  ;;  %v1318_v59 = vld [vmem:[%s1523_s4] ss:$0 sm:$0xff] }
  0x48   :  { %677 = vmatpush.bf16.msrb.mxu0 %v1264_v60 }
  0x49   :  { %690 = vmatpush.bf16.msrb.mxu1 %v1272_v61 }
  0x4a   :  { %703 = vmatpush.bf16.msrb.mxu2 %v1280_v62 }
  0x4b   :  { %716 = vmatpush.bf16.msrb.mxu3 %v1288_v63 }
  0x4c   :  { %678 = vmatpush.bf16.msrb.mxu0 %v1263_v0 }
  0x4d   :  { %691 = vmatpush.bf16.msrb.mxu1 %v1271_v1  ;;  %v1319_v1 = vld [vmem:[%s1525_s6] ss:$0 sm:$0xff] }
  0x4e   :  { %704 = vmatpush.bf16.msrb.mxu2 %v1279_v2 }
  0x4f   :  { %717 = vmatpush.bf16.msrb.mxu3 %v1287_v3 }
  0x50   :  { %679 = vmatpush.bf16.msrb.mxu0 %v1262_v4 }
  0x51   :  { %692 = vmatpush.bf16.msrb.mxu1 %v1270_v5 }
  0x52   :  { %705 = vmatpush.bf16.msrb.mxu2 %v1278_v6 }
  0x53   :  { %718 = vmatpush.bf16.msrb.mxu3 %v1286_v9  ;;  %680 = vmatmul.bf16.vlgmr.msrb.gmra.mxu0 %v229_v12 }
  0x54   :  { %693 = vmatmul.bf16.vlgmr.msrb.gmra.mxu1 %v230_v13  ;;  %794 = vmatpush.bf16.msra.mxu0 %v1301_v16 }
  0x55   :  { %706 = vmatmul.bf16.vlgmr.msrb.gmra.mxu2 %v231_v14  ;;  %877 = vmatpush.bf16.msra.mxu1 %v1309_v31 }
  0x56   :  { %719 = vmatmul.bf16.vlgmr.msrb.gmra.mxu3 %v232_v15 }
  0x58   :  { %795 = vmatpush.bf16.msra.mxu0 %v1300_v17 }
  0x59   :  { %878 = vmatpush.bf16.msra.mxu1 %v1308_v34 }
  0x5c   :  { %796 = vmatpush.bf16.msra.mxu0 %v1299_v18 }
  0x5d   :  { %879 = vmatpush.bf16.msra.mxu1 %v1307_v36 }
  0x60   :  { %797 = vmatpush.bf16.msra.mxu0 %v1298_v19 }
  0x61   :  { %880 = vmatpush.bf16.msra.mxu1 %v1306_v38 }
  0x64   :  { %798 = vmatpush.bf16.msra.mxu0 %v1297_v20 }
  0x65   :  { %881 = vmatpush.bf16.msra.mxu1 %v1305_v40 }
  0x68   :  { %799 = vmatpush.bf16.msra.mxu0 %v1296_v22 }
  0x69   :  { %882 = vmatpush.bf16.msra.mxu1 %v1304_v45 }
  0x6c   :  { %800 = vmatpush.bf16.msra.mxu0 %v1295_v24 }
  0x6d   :  { %883 = vmatpush.bf16.msra.mxu1 %v1303_v57 }
  0x70   :  { %801 = vmatpush.bf16.msra.mxu0 %v1294_v28 }
  0x71   :  { %884 = vmatpush.bf16.msra.mxu1 %v1302_v58 }
  0xb0   :  { %v629_v21 = vpop.f32.mrf.mxu0 }
  0xb1   :  { %v642_v23 = vpop.f32.mrf.mxu1  ;;  %v630_v35 = vadd.f32 %v1317_v30, %v629_v21 }
  0xb3   :  { %v643_v37 = vadd.f32 %v642_v23, %v630_v35 }
  0xb8   :  { %v655_v25 = vpop.f32.mrf.mxu2  ;;  %v631_v27 = vpop.f32.mrf.mxu0 }
  0xb9   :  { %v668_v26 = vpop.f32.mrf.mxu3  ;;  %v644_v29 = vpop.f32.mrf.mxu1  ;;  %v656_v39 = vadd.f32 %v655_v25, %v643_v37 }
  0xbb   :  { %v669_v41 = vadd.f32 %v668_v26, %v656_v39 }
  0xc0   :  { %v657_v32 = vpop.f32.mrf.mxu2 }
  0xc1   :  { %v670_v33 = vpop.f32.mrf.mxu3 }
  0xd0   :  { %v681_v42 = vpop.f32.mrf.mxu0 }
  0xd1   :  { %v694_v43 = vpop.f32.mrf.mxu1  ;;  %v682_v44 = vadd.f32 %v681_v42, %v669_v41 }
  0xd3   :  { %v695_v46 = vadd.f32 %v694_v43, %v682_v44 }
  0xd8   :  { %v707_v47 = vpop.f32.mrf.mxu2  ;;  %v683_v50 = vpop.f32.mrf.mxu0 }
  0xd9   :  { %v720_v48 = vpop.f32.mrf.mxu3  ;;  %v708_v49 = vadd.f32 %v707_v47, %v695_v46  ;;  %v696_v51 = vpop.f32.mrf.mxu1 }
  0xdb   :  { %v721_v52 = vadd.f32 %v720_v48, %v708_v49 }
  0xdd   :  { %v724_v53 = vmax.f32 %v721_v52, 0.0 }
  0xdf   :  { %v742_v54 = vpack.c.bf16 %v724_v53, %v724_v53 }
  0xe0   :  { %v709_v55 = vpop.f32.mrf.mxu2 }
  0xe1   :  { %v722_v56 = vpop.f32.mrf.mxu3  ;;  %802 = vmatmul.bf16.vlgmr.msra.gmra.mxu0 %v742_v54 }
 0x15e   :  { %v803_v60 = vpop.f32.mrf.mxu0 }
 0x15f   :  { %v804_v61 = vadd.f32 %v1318_v59, %v803_v60 }
 0x161   :  { %v807_v62 = vmax.f32 %v804_v61, 0.0 }
 0x163   :  { %v825_v63 = vpack.c.bf16 %v807_v62, %v807_v62 }
 0x165   :  { %885 = vmatmul.bf16.vlgmr.msra.gmra.mxu1 %v825_v63 }
 0x166   :  { %v805_v0 = vpop.f32.mrf.mxu0 }
 0x1e2   :  { %v886_v2 = vpop.f32.mrf.mxu1 }
 0x1e3   :  { %v887_v3 = vadd.f32 %v1319_v1, %v886_v2 }
 0x1e5   :  { %890 = vst [vmem:[#allocation10] sm:$0xff] %v887_v3 }
 0x1e6   :  { %901 = dma.vmem_to_hbm [thread:$0]  %s897_s25, 128, %s899_s28, [#allocation4]  }
 0x1ea   :  { %v888_v4 = vpop.f32.mrf.mxu1 }
 0x1eb   :  { %1446 = dma.done.wait [#allocation4], 128  }
 0x1ec   :  { %1447 = vsyncadd [#allocation4], 4294967168 }
 0x1ed   :  { %906 = vsyncpa [#allocation3], 1 }
 0x1ee   :  { %907 = vsyncpa [#allocation6], 1 }
 0x1ef   :  { %908 = vsyncpa [#allocation9], 1 }
 0x1f0   :  { %909 = vsyncpa [#allocation4], 1 }

</bundles_post_ra>
